<compile_context>
chip_gen: v6e
topology: v6e:2x2x1
jax: 0.10.0
libtpu: 0.0.40
codegen_flags: <defaults>
</compile_context>

<pallas_src>
import jax
import jax.numpy as jnp
from jax.experimental import pallas as pl
from jax.experimental.pallas import tpu as pltpu


def _round_up(x, m):
    return (x + m - 1) // m * m


def _patch_embed_kernel(a_ref, w_ref, b_ref, o_ref):
    # a_ref: (TM, K_pad)     compute_dtype patch rows (streamed tile per grid step)
    # w_ref: (K_pad, E_pad)  compute_dtype flattened conv weight (VMEM-resident)
    # b_ref: (1, E_pad)      f32 bias (VMEM-resident)
    # o_ref: (TM, E_pad)     out_dtype output tile
    acc = jnp.dot(a_ref[...], w_ref[...], preferred_element_type=jnp.float32)
    o_ref[...] = (acc + b_ref[...]).astype(o_ref.dtype)


def patch_embed(
    x,
    weight,
    bias,
    patch_size,
    *,
    tile_m=1024,
    compute_dtype=jnp.bfloat16,
    out_dtype=jnp.bfloat16,
    vmem_budget_bytes=40 * 1024 * 1024,
):
    """
    x:      (B, C, H, W)  float32 (NCHW, like PyTorch)
    weight: (E, C, P, P)  conv weight (kernel == stride == P)
    bias:   (E,)          conv bias
    returns (B, num_patches, E) in out_dtype — matches proj(x).flatten(2).transpose(1, 2)
    (norm_layer=None -> nn.Identity(), so no norm is applied.)
    """
    B, C, H, W = x.shape
    E = weight.shape[0]
    P = patch_size
    assert H % P == 0 and W % P == 0, "image size must be divisible by patch size"
    GH, GW = H // P, W // P
    num_patches = GH * GW

    # ---- glue: im2col (row-major over (gh, gw), matching flatten(2).transpose(1,2)) ----
    # Cast to compute_dtype *before* the rearrange so any materialized copy / the A-tile
    # DMA stream is half-size; allow_input_fusion lets XLA try to fuse this into the
    # Pallas input instead of writing a second HBM copy of x.
    xc = x.astype(compute_dtype)
    patches = xc.reshape(B, C, GH, P, GW, P)
    patches = jnp.transpose(patches, (0, 2, 4, 1, 3, 5))
    a = patches.reshape(B * num_patches, C * P * P)

    # (E, C, P, P) -> (K, E); bias kept f32 for the epilogue add.
    w = weight.reshape(E, C * P * P).T.astype(compute_dtype)
    b = bias.reshape(1, E).astype(jnp.float32)

    M, K = a.shape

    # ---- lane alignment ----
    # K is the lane dim of A / sublane dim of W feeding the MXU: pad to 128.
    K_pad = _round_up(K, 128)
    # E is the output lane dim: pad to 128; if that lands in (128, 256) pad to 256 so the
    # 2x256x256 MXU (v6e/v7x) runs at full width.  Padded lanes are zero and sliced off.
    E_pad = _round_up(E, 128)
    if 128 < E_pad < 256:
        E_pad = 256

    if K_pad != K or E_pad != E:
        w = jnp.pad(w, ((0, K_pad - K), (0, E_pad - E)))
    if E_pad != E:
        b = jnp.pad(b, ((0, 0), (0, E_pad - E)))

    in_bytes = jnp.dtype(compute_dtype).itemsize
    out_bytes = jnp.dtype(out_dtype).itemsize

    def vmem_need(tm):
        return (
            2 * tm * K_pad * in_bytes      # A tile, double-buffered
            + 2 * K_pad * E_pad * in_bytes  # weight (budgeted 2x, conservatively)
            + 2 * E_pad * 4                 # bias
            + 2 * tm * E_pad * out_bytes    # out tile, double-buffered
        )

    # ---- row tile: multiple of 16 (bf16 sublane packing), fits the VMEM budget ----
    M16 = _round_up(M, 16)
    TM = _round_up(min(tile_m, M16), 16)
    while TM > 16 and vmem_need(TM) > vmem_budget_bytes:
        TM = _round_up(TM // 2, 16)
    # v7x has two TensorCores: if one tile would cover everything but there is enough
    # work to split, use two tiles so both cores get a block (grid >= 2, even).
    if TM >= M16 and M16 >= 32:
        TM = _round_up((M16 + 1) // 2, 16)

    M_pad = _round_up(M, TM)
    if M_pad != M or K_pad != K:
        a = jnp.pad(a, ((0, M_pad - M), (0, K_pad - K)))

    grid = (M_pad // TM,)

    # Explicit scoped-VMEM limit: above the 16 MiB (v5e) / 32 MiB (v6e, v7x) defaults,
    # sized to the actual double-buffered tiles, capped safely below v7x's 64 MiB part.
    vmem_limit = int(min(max(vmem_need(TM) + (4 << 20), 16 << 20), 56 << 20))

    out = pl.pallas_call(
        _patch_embed_kernel,
        out_shape=jax.ShapeDtypeStruct((M_pad, E_pad), out_dtype),
        grid_spec=pl.GridSpec(
            grid=grid,
            in_specs=[
                pl.BlockSpec((TM, K_pad), lambda i: (i, 0)),      # streamed A tiles
                pl.BlockSpec((K_pad, E_pad), lambda i: (0, 0)),   # resident weight
                pl.BlockSpec((1, E_pad), lambda i: (0, 0)),       # resident bias
            ],
            out_specs=pl.BlockSpec((TM, E_pad), lambda i: (i, 0)),
        ),
        compiler_params=pltpu.CompilerParams(
            # M axis is independent across tiles -> shardable across TCs on v7x.
            dimension_semantics=("parallel",),
            vmem_limit_bytes=vmem_limit,
            # Let XLA fuse the im2col reshape/transpose/pad into the A operand.
            allow_input_fusion=[True, False, False],
        ),
    )(a, w, b)

    # Avoid post-call copies when no padding was added (the common real-ViT config).
    if E_pad != E:
        out = out[:, :E]
    if M_pad != M:
        out = out[:M]
    return out.reshape(B, num_patches, E)


if __name__ == "__main__":
    # Small shapes consistent with the module: img_size=16, patch_size=4,
    # in_c=4, embed_dim=32, batch=2  -> num_patches = (16/4)^2 = 16
    B, C, H, W = 2, 4, 16, 16
    P = 4
    E = 32

    key = jax.random.PRNGKey(0)
    kx, kw, kb = jax.random.split(key, 3)

    x = jax.random.normal(kx, (B, C, H, W), dtype=jnp.float32)
    # Shapes match nn.Conv2d(in_c, embed_dim, kernel_size=P, stride=P)
    weight = jax.random.normal(kw, (E, C, P, P), dtype=jnp.float32) * 0.02
    bias = jax.random.normal(kb, (E,), dtype=jnp.float32) * 0.02

    out = patch_embed(x, weight, bias, P)
    out = jax.block_until_ready(out)

    # Pure-JAX f32 reference of the exact PyTorch PatchEmbed forward.
    GH, GW = H // P, W // P
    ref_patches = jnp.transpose(
        x.reshape(B, C, GH, P, GW, P), (0, 2, 4, 1, 3, 5)
    ).reshape(B * GH * GW, C * P * P)
    ref = (ref_patches @ weight.reshape(E, -1).T + bias).reshape(B, GH * GW, E)

    assert out.shape == (B, GH * GW, E)
    # bf16 inputs + f32 accumulation + bf16 output -> widened tolerance vs f32 reference.
    err = float(jnp.max(jnp.abs(out.astype(jnp.float32) - ref)))
    assert err < 2e-2, err

    print("KERNEL_OK")
</pallas_src>

<mosaic_0001>
module attributes {stable_mosaic.version = 11 : i64} {
  func.func @_patch_embed_kernel(%arg0: i32, %arg1: memref<16x128xbf16, #tpu.memory_space<vmem>>, %arg2: memref<128x128xbf16, #tpu.memory_space<vmem>>, %arg3: memref<1x128xf32, #tpu.memory_space<vmem>>, %arg4: memref<16x128xbf16, #tpu.memory_space<vmem>>) attributes {dimension_semantics = [#tpu.dimension_semantics<parallel>], iteration_bounds = array<i64: 2>, scalar_prefetch = 0 : i64, scratch_operands = 0 : i64, tpu.core_type = #tpu.core_type<tc>, window_params = [{transform_indices = @transform_0, window_bounds = array<i64: 16, 128>}, {pipeline_mode = #tpu.pipeline_mode<synchronous>, transform_indices = @transform_1, window_bounds = array<i64: 128, 128>}, {pipeline_mode = #tpu.pipeline_mode<synchronous>, transform_indices = @transform_2, window_bounds = array<i64: 1, 128>}, {transform_indices = @transform_3, window_bounds = array<i64: 16, 128>}]} {
    %c0 = arith.constant 0 : index
    %c0_0 = arith.constant 0 : index
    %0 = vector.load %arg1[%c0, %c0_0] : memref<16x128xbf16, #tpu.memory_space<vmem>>, vector<16x128xbf16>
    %c0_1 = arith.constant 0 : index
    %c0_2 = arith.constant 0 : index
    %1 = vector.load %arg2[%c0_1, %c0_2] : memref<128x128xbf16, #tpu.memory_space<vmem>>, vector<128x128xbf16>
    %cst = arith.constant dense<0.000000e+00> : vector<16x128xf32>
    %2 = tpu.matmul %0, %1, %cst {dimension_numbers = #tpu.dot_dimension_numbers<[1], [0], [0], [1], [0, 0, 1, 1], [], []>} : vector<16x128xbf16>, vector<128x128xbf16>, vector<16x128xf32> -> vector<16x128xf32>
    %c0_3 = arith.constant 0 : index
    %c0_4 = arith.constant 0 : index
    %3 = vector.load %arg3[%c0_3, %c0_4] : memref<1x128xf32, #tpu.memory_space<vmem>>, vector<1x128xf32>
    %4 = vector.broadcast %3 : vector<1x128xf32> to vector<16x128xf32>
    %5 = arith.addf %2, %4 : vector<16x128xf32>
    %6 = arith.truncf %5 : vector<16x128xf32> to vector<16x128xbf16>
    %c0_5 = arith.constant 0 : index
    %c0_6 = arith.constant 0 : index
    %7 = vector.load %arg4[%c0_5, %c0_6] : memref<16x128xbf16, #tpu.memory_space<vmem>>, vector<16x128xbf16>
    tpu.vector_store %arg4[%c0_5, %c0_6], %6 {strides = array<i32>} : memref<16x128xbf16, #tpu.memory_space<vmem>>, vector<16x128xbf16>,
    return
  }
  func.func @transform_0(%arg0: i32) -> (i32, i32) {
    %c0_i32 = arith.constant 0 : i32
    %c0_i32_0 = arith.constant 0 : i32
    return %arg0, %c0_i32 : i32, i32
  }
  func.func @transform_1(%arg0: i32) -> (i32, i32) {
    %c0_i32 = arith.constant 0 : i32
    %c0_i32_0 = arith.constant 0 : i32
    %c0_i32_1 = arith.constant 0 : i32
    return %c0_i32, %c0_i32_0 : i32, i32
  }
  func.func @transform_2(%arg0: i32) -> (i32, i32) {
    %c0_i32 = arith.constant 0 : i32
    %c0_i32_0 = arith.constant 0 : i32
    %c0_i32_1 = arith.constant 0 : i32
    return %c0_i32, %c0_i32_0 : i32, i32
  }
  func.func @transform_3(%arg0: i32) -> (i32, i32) {
    %c0_i32 = arith.constant 0 : i32
    %c0_i32_0 = arith.constant 0 : i32
    return %arg0, %c0_i32 : i32, i32
  }
}

</mosaic_0001>

<bundles_post_ra>
// kernel: tpu_custom_call.1
= control target key start
LH: loop header
LB: loop body
LE: loop exit
PB: predicated region body
PF: predicated region fallthrough
CT: control target
= control target key end

     0   :  { %8 = vsyncpa [#allocation3], 0  ;;  %s918_s0 = inlined_call_operand.hbm [shape: bf16[32,128], index: 0, kind: input, shape index: {}]   ;;  %s919_s1 = inlined_call_operand.hbm [shape: bf16[128,128], index: 1, kind: input, shape index: {}]   ;;  %s920_s2 = inlined_call_operand.vmem [shape: f32[1,128], index: 2, kind: input, shape index: {}]   ;;  %s921_s3 = inlined_call_operand.hbm [shape: bf16[32,128], index: 3, kind: output, shape index: {}]  }
   0x1   :  { %10 = vsyncpa [#allocation3 + $0x1], 0 }
   0x2   :  { %11 = vsyncpa [#allocation6], 0 }
   0x3   :  { %12 = vsyncpa [#allocation4], 0 }
   0x4   :  { %14 = vsyncpa [#allocation4 + $0x1], 0  ;;  %s725_s12 = smov 0   ;;  %s727_s13 = smov 0  }
   0x5   :  { %s729_s14 = smov 0   ;;  %s731_s15 = smov 0  }
   0x6 LB: > { %s746_s16 = sadd.s32 4294967295, %s694_s15   ;;  %s434_s17 = sadd.s32 4294967294, %s694_s15   ;;  %s694_s15 = sphi %s731_s15, %s943_s15   ;;  %s690_s14 = sphi %s729_s14, %s942_s14   ;;  %s686_s13 = sphi %s727_s13, %s941_s13   ;;  %s682_s12 = sphi %s725_s12, %s940_s12  }
   0x7   : > { %p40_p0 = scmp.ne.s32.totalorder %s686_s13, %s682_s12  ;;  %p922_p1 = scmp.eq.s32.totalorder %s746_s16, 0 }
   0x8   : > { %p112_p3 = scmp.eq.s32.totalorder %s434_s17, 1  ;;  %p435_p5 = scmp.ge.s32.totalorder %s694_s15, 1 }
   0x9   : > { %p755_p4 = por %p922_p1, %p40_p0  ;;  %p119_p7 = scmp.lt.s32.totalorder %s694_s15, 3 }
   0xa   : > { %p760_p6 = por %p112_p3, %p40_p0  ;;  %s696_s21 = smov [#allocation5]  }
   0xb   : > { %s926_s18 = scalar_select %p755_p4, 1, 0 }
   0xc   : > { %s927_s19 = scalar_select %p760_p6, 1, 0 }
   0xd   : > { %p765_p8 = pnand %p435_p5, %p119_p7  ;;  %s131_s22 = sshll.u32 %s696_s21, 4  ;;  %s132_s22 = int_to_ptr.vmem [resolvable:$true] %s131_s22 }
   0xe   : > { %s779_s24 = sadd.s32 1, %s694_s15   ;;  %s27_s25 = sadd.s32 1, %s690_s14 }
   0xf   : > { %s928_s20 = scalar_select %p765_p8, 1, 0 }
  0x10   : > { %p508_p9 = pneg %p765_p8  ;;  %s24_s26 = ssub.s32 %s694_s15, %s779_s24 }
  0x11   : > { %s583_s27 = scalar_lea.vmem %s132_s22, 1024  ;;  %p591_p5 = scmp.lt.s32.totalorder %s132_s22, %s132_s22 }
  0x12   : > { %p774_p11 = pnand %p508_p9, %p922_p1  ;;  %p584_p13 = scmp.ne.s32.totalorder %s132_s22, %s583_s27 }
  0x13   : > { %p592_p7 = scmp.lt.s32.totalorder %s583_s27, %s583_s27 }
  0x14   : > { %p574_p12 = pneg %p774_p11 }
  0x15   : > { %p593_p10 = por %p592_p7, %p591_p5 }
  0x16   : > { %p586_p0 = pnand %p584_p13, %p574_p12 }
  0x18   : > { %p587_p3 = pneg %p586_p0 }
  0x1a   : > { %p594_p2 = pnand %p593_p10, %p587_p3 }
  0x1c   : > { %597 = shalt.err (!%p594_p2)
}
  0x1d   : > { %s697_s28 = smov 64   ;;  %s698_s29 = smov 4  }
  0x1e   : > { %511 = dma.hbm_to_vmem [thread:$0]  (!%p774_p11), %s919_s1, 1024, %s132_s22, [#allocation6], %s697_s28, %s697_s28, %s698_s29  }
  0x1f   : > { %p25_p2 = scmp.eq.s32.totalorder %s24_s26, 0  ;;  %p34_p9 = scmp.ne.s32.totalorder %s690_s14, %s686_s13 }
  0x20   : > { %p35_p10 = scmp.eq.s32.totalorder %s694_s15, 0  ;;  %p521_p12 = scmp.lt.s32.totalorder %s694_s15, 2 }
  0x21   : > { %s799_s5 = scalar_select %p25_p2, %s690_s14, %s27_s25  }
  0x22   : > { %p36_p13 = por %p35_p10, %p34_p9  ;;  %p930_p0 = scmp.eq.s32.totalorder %s746_s16, 1 }
  0x23   : > { %s148_s7 = sand.u32 1, %s690_s14   ;;  %s462_s8 = sshll.u32 %s694_s15, 7 }
  0x24   : > { %p803_p3 = por %p930_p0, %p34_p9  ;;  %s438_s9 = sshll.u32 %s148_s7, 3 }
  0x25   : > { %s812_s17 = scalar_lea.hbm %s918_s0, %s462_s8  ;;  %s152_s21 = scalar_lea.vmem [#allocation2], %s438_s9 }
  0x26   : > { %s931_s6 = scalar_select %p803_p3, 1, 0 }
  0x27   : > { %s159_s22 = sshll.u32 %s152_s21, 4  ;;  %p814_p11 = pnand %p521_p12, %p36_p13  ;;  %s818_s22 = int_to_ptr.vmem [resolvable:$true] %s159_s22 }
  0x28   : > { %s820_s25 = scalar_lea.sflag [#allocation3], %s148_s7  ;;  %s598_s26 = scalar_lea.hbm %s812_s17, 128 }
  0x29   : > { %p599_p5 = scmp.ne.s32.totalorder %s812_s17, %s598_s26  ;;  %p600_p7 = pneg %p814_p11 }
  0x2a   : > { %s603_s4 = scalar_lea.hbm %s918_s0, 256  ;;  %p604_p10 = scmp.lt.s32.totalorder %s812_s17, %s918_s0 }
  0x2b   : > { %p601_p2 = pnand %p600_p7, %p599_p5  ;;  %p605_p12 = scmp.lt.s32.totalorder %s603_s4, %s598_s26 }
  0x2d   : > { %p602_p9 = pneg %p601_p2  ;;  %p606_p13 = por %p605_p12, %p604_p10 }
  0x2f   : > { %p607_p0 = pnand %p606_p13, %p602_p9 }
  0x31   : > { %610 = shalt.err (!%p607_p0)
}
  0x32   : > { %s611_s7 = scalar_lea.vmem %s818_s22, 128  ;;  %s699_s10 = smov [#allocation2]  }
  0x33   : > { %p612_p1 = scmp.ne.s32.totalorder %s818_s22, %s611_s7  ;;  %s616_s11 = sshll.u32 %s699_s10, 4  ;;  %s617_s11 = int_to_ptr.vmem [resolvable:$false] %s616_s11 }
  0x34   : > { %s618_s21 = scalar_lea.vmem %s617_s11, 256  ;;  %p619_p2 = scmp.lt.s32.totalorder %s818_s22, %s617_s11 }
  0x35   : > { %p614_p6 = pnand %p612_p1, %p600_p7  ;;  %p620_p3 = scmp.lt.s32.totalorder %s618_s21, %s611_s7 }
  0x37   : > { %p615_p5 = pneg %p614_p6  ;;  %p621_p4 = por %p620_p3, %p619_p2 }
  0x39   : > { %p622_p8 = pnand %p621_p4, %p615_p5 }
  0x3b   : > { %625 = shalt.err (!%p622_p8)
}
  0x3c   : > { %515 = dma.hbm_to_vmem [thread:$0]  (!%p814_p11), %s812_s17, 128, %s818_s22, %s820_s25, %s697_s28, %s697_s28, %s698_s29  }
  0x3d   : > { %p933_p1 = scmp.ne.s32.totalorder %s928_s20, 0 }
  0x3e   : > { %s847_s26 = sand.u32 (!%p933_p1), 1, %s686_s13   ;;  %p934_p4 = scmp.ne.s32.totalorder (!%p933_p1), %s926_s18, 0 }
  0x3f   : > { %171 = sbr.rel (%p933_p1) target bundleno = 320 (0x140), region = 32  ;;  %s442_s27 = sshll.u32 (!%p933_p1), %s847_s26, 3 }
  0x40   : > { %s174_s30 = scalar_lea.sflag (!%p933_p1), [#allocation3], %s847_s26  ;;  %s853_s23 = scalar_lea.vmem (!%p933_p1), [#allocation2], %s442_s27 }
  0x44   : > { %669 = dma.done.wait (%p934_p4), %s174_s30, 128  }
  0x45   : > { %671 = vsyncadd (%p934_p4), %s174_s30, 4294967168  ;;  %p935_p6 = scmp.eq.s32.totalorder %s746_s16, 0 }
  0x47   : > { %673 = dma.done.wait (%p935_p6), [#allocation6], 1024   ;;  %p936_p8 = pmov %p935_p6 }
  0x48   : > { %v700_v0 = vmov 0.0   ;;  %vm701_vm0 = vmmov 0   ;;  %v563_v1 = vld [vmem:[#allocation5 + $0x38] sm:$0xff]   ;;  %v564_v2 = vld [vmem:[#allocation5 + $0x30] sm:$0xff]   ;;  %v565_v3 = vld [vmem:[#allocation5 + $0x28] sm:$0xff]   ;;  %s203_s28 = scalar_lea.vmem [#allocation7], %s442_s27 }
  0x49   : > { %675 = vsyncadd (%p936_p8), [#allocation6], 4294966272  ;;  %480 = vmatprep.subr.bf16.mxu0 %v700_v0  ;;  %496 = vmatprep.mubr.msk.bf16.mxu0 %vm701_vm0, %v700_v0  ;;  %v566_v4 = vld [vmem:[#allocation5 + $0x20] sm:$0xff]   ;;  %v567_v5 = vld [vmem:[#allocation5 + $0x18] sm:$0xff]   ;;  %s351_s29 = sshll.u32 %s203_s28, 4  ;;  %s465_s17 = sshll.u32 %s746_s16, 7  ;;  %s870_s29 = int_to_ptr.vmem [resolvable:$true] %s351_s29 }
  0x4a   : > { %481 = vmatpush3.bf16.msra.mxu0 %v563_v1  ;;  %v568_v6 = vld [vmem:[#allocation5 + $0x10] sm:$0xff]   ;;  %v569_v7 = vld [vmem:[#allocation5 + $0x8] sm:$0xff]   ;;  %v570_v8 = vld [vmem:[#allocation5] sm:$0xff]   ;;  %s875_s4 = scalar_lea.hbm %s921_s3, %s465_s17  ;;  %s338_s8 = scalar_lea.sflag [#allocation4], %s847_s26 }
  0x4b   : > { %482 = vmatprep.subr.bf16.mxu0 %v700_v0  ;;  %v571_v9 = vld [vmem:[%s853_s23] sm:$0xff]   ;;  %s626_s9 = scalar_lea.vmem %s870_s29, 128  ;;  %p937_p11 = scmp.ne.s32.totalorder %s931_s6, 0 }
  0x4c   : > { %v445_v11 = vld [vmem:[%s920_s2] ss:$0 sm:$0xff]  ;;  %p627_p3 = scmp.ne.s32.totalorder %s870_s29, %s626_s9  ;;  %s702_s16 = smov [#allocation7]  }
  0x4d   : > { %s630_s7 = sshll.u32 %s702_s16, 4  ;;  %s631_s7 = int_to_ptr.vmem [resolvable:$false] %s630_s7 }
  0x4e   : > { %483 = vmatpush3.bf16.msra.mxu0 %v564_v2  ;;  %p628_p7 = pnand %p627_p3, %p937_p11  ;;  %s632_s10 = scalar_lea.vmem %s631_s7, 256 }
  0x4f   : > { %484 = vmatprep.subr.bf16.mxu0 %v700_v0  ;;  %p633_p10 = scmp.lt.s32.totalorder %s870_s29, %s631_s7  ;;  %p634_p12 = scmp.lt.s32.totalorder %s632_s10, %s626_s9 }
  0x50   : > { %p629_p9 = pneg %p628_p7 }
  0x51   : > { %p635_p13 = por %p634_p12, %p633_p10 }
  0x52   : > { %485 = vmatpush3.bf16.msra.mxu0 %v565_v3 }
  0x53   : > { %486 = vmatprep.subr.bf16.mxu0 %v700_v0  ;;  %p636_p0 = pnand %p635_p13, %p629_p9 }
  0x56   : > { %487 = vmatpush3.bf16.msra.mxu0 %v566_v4 }
  0x57   : > { %488 = vmatprep.subr.bf16.mxu0 %v700_v0 }
  0x5a   : > { %489 = vmatpush3.bf16.msra.mxu0 %v567_v5 }
  0x5b   : > { %490 = vmatprep.subr.bf16.mxu0 %v700_v0 }
  0x5e   : > { %491 = vmatpush3.bf16.msra.mxu0 %v568_v6 }
  0x5f   : > { %492 = vmatprep.subr.bf16.mxu0 %v700_v0 }
  0x62   : > { %493 = vmatpush3.bf16.msra.mxu0 %v569_v7 }
  0x63   : > { %494 = vmatprep.subr.bf16.mxu0 %v700_v0 }
  0x66   : > { %495 = vmatpush3.bf16.msra.mxu0 %v570_v8 }
  0x69   : > { %497 = vmatmul.mubr.bf16.vlgmr.msra.gmra.mxu0 %v571_v9 }
 0x129   : > { %v320_v10 = vpop.f32.mrf.mxu0 }
 0x12a   : > { %v321_v14 = vadd.f32 %v445_v11, %v320_v10 }
 0x12b   : > { %v498_v12 = vpop.f32.mrf.mxu0 }
 0x12d   : > { %v323_v13 = vpop.f32.mrf.mxu0 }
 0x12e   : > { %v324_v15 = vadd.f32 %v445_v11, %v323_v13 }
 0x12f   : > { %v499_v16 = vpop.f32.mrf.mxu0 }
 0x130   : > { %v469_v17 = vpack.c.bf16 %v324_v15, %v321_v14 }
 0x132   : > { %470 = vst [vmem:[%s203_s28] sm:$0xff] %v469_v17  }
 0x133   : > { %639 = shalt.err (!%p636_p0)
}
 0x134   : > { %s640_s11 = scalar_lea.hbm %s875_s4, 128  ;;  %s644_s30 = scalar_lea.hbm %s921_s3, 256 }
 0x135   : > { %p641_p5 = scmp.ne.s32.totalorder %s875_s4, %s640_s11  ;;  %p645_p4 = scmp.lt.s32.totalorder %s875_s4, %s921_s3 }
 0x136   : > { %p646_p6 = scmp.lt.s32.totalorder %s644_s30, %s640_s11 }
 0x137   : > { %p642_p2 = pnand %p641_p5, %p937_p11 }
 0x138   : > { %p647_p8 = por %p646_p6, %p645_p4 }
 0x139   : > { %p643_p1 = pneg %p642_p2 }
 0x13b   : > { %p648_p3 = pnand %p647_p8, %p643_p1 }
 0x13d   : > { %651 = shalt.err (!%p648_p3)
}
 0x13e   : > { %s703_s20 = smov 64   ;;  %s704_s28 = smov 4  }
 0x13f   : > { %506 = dma.vmem_to_hbm [thread:$0]  (%p937_p11), %s870_s29, 128, %s875_s4, %s338_s8, %s703_s20, %s703_s20, %s704_s28  }
 0x140 PF: > { %s366_s17 = sand.u32 1, %s682_s12   ;;  %p938_p7 = scmp.ne.s32.totalorder %s927_s19, 0 }
 0x141   : > { %p939_p9 = scmp.ge.s32.totalorder %s694_s15, 2  ;;  %s367_s22 = scalar_lea.sflag [#allocation4], %s366_s17 }
 0x143   : > { %p517_p10 = pnand %p939_p9, %p938_p7 }
 0x145   : > { %p518_p12 = pneg %p517_p10 }
 0x147   : > { %677 = dma.done.wait (%p518_p12), %s367_s22, 128  }
 0x148   : > { %679 = vsyncadd (%p518_p12), %s367_s22, 4294967168  ;;  %p17_p13 = scmp.ge.s32.totalorder %s779_s24, 4   ;;  %s940_s12 = smov %s686_s13 }
 0x149   : > { %s941_s13 = smov %s690_s14  ;;  %s942_s14 = smov %s799_s5 }
 0x14a   : > { %s943_s15 = smov %s779_s24  ;;  %19 = sbr.rel (!%p17_p13) target bundleno = 6 (0x6), region = 81 }
 0x14f   :  { %372 = vsyncpa [#allocation3], 1 }
 0x150   :  { %374 = vsyncpa [#allocation3 + $0x1], 1 }
 0x151   :  { %375 = vsyncpa [#allocation6], 1 }
 0x152   :  { %376 = vsyncpa [#allocation4], 1 }
 0x153   :  { %378 = vsyncpa [#allocation4 + $0x1], 1 }

</bundles_post_ra>
